<compile_context>
chip_gen: v5e
topology: v5e:2x2
jax: 0.10.0
libtpu: 0.0.40
codegen_flags: <defaults>
</compile_context>

<pallas_src>
import functools

import jax
import jax.numpy as jnp
import numpy as np
from jax.experimental import pallas as pl
from jax.experimental.pallas import tpu as pltpu


def _conv_matmul_kernel(a_ref, b_ref, o_ref, acc_ref):
    # a_ref:   (TM, TK) bf16   im2col patch tile
    # b_ref:   (TK, TN) bf16   reshaped conv weights (resident across M tiles)
    # o_ref:   (TM, TN) f32    conv output tile (TN is a multiple of 128 -> lane-dense stores)
    # acc_ref: (TM, TN) f32    VMEM accumulator, carried across the K grid axis
    @pl.when(pl.program_id(2) == 0)
    def _init():
        acc_ref[...] = jnp.zeros_like(acc_ref)

    acc_ref[...] += jnp.dot(a_ref[...], b_ref[...],
                            preferred_element_type=jnp.float32)

    @pl.when(pl.program_id(2) == pl.num_programs(2) - 1)
    def _finalize():
        o_ref[...] = acc_ref[...].astype(o_ref.dtype)


def _round_up(v, m):
    return ((v + m - 1) // m) * m


def _pick_tm(m):
    # Largest M tile that still yields >= 2 grid steps (pipelining + both TCs on v7x
    # even at batch 1); capped so double-buffered tiles stay far under v7x's 64 MiB VMEM.
    for tm in (1024, 512, 256, 128):
        if m >= 2 * tm:
            return tm
    return 128


def conv2d_forward(x_nchw, weight, *, stride=1, groups=1):
    """Forward of module `C`: Conv2d(bias=False, padding=(k-1)//2).

    x_nchw: (B, Cin, H, W)   weight: PyTorch layout (Cout, Cin, KH, KW).
    """
    if groups != 1:
        # TODO(synk): grouped convolution (groups > 1) not implemented; module default is groups=1.
        raise NotImplementedError("groups > 1 not supported")

    B, Cin, Hin, Win = x_nchw.shape
    Cout, _, KH, KW = weight.shape
    pad_h = (KH - 1) // 2
    pad_w = (KW - 1) // 2
    Hout = (Hin + 2 * pad_h - KH) // stride + 1
    Wout = (Win + 2 * pad_w - KW) // stride + 1

    # ---- wrapper glue (XLA): NCHW -> NHWC, bf16 cast, spatial pad, im2col -------------
    x = jnp.transpose(x_nchw, (0, 2, 3, 1)).astype(jnp.bfloat16)
    x_pad = jnp.pad(x, ((0, 0), (pad_h, pad_h), (pad_w, pad_w), (0, 0)))

    # Patches ordered (kh, kw, cin) along the last axis; stride applied here so only the
    # required output positions are materialized / computed.
    patches = []
    for kh in range(KH):
        for kw in range(KW):
            h_stop = kh + (Hout - 1) * stride + 1
            w_stop = kw + (Wout - 1) * stride + 1
            patches.append(x_pad[:, kh:h_stop:stride, kw:w_stop:stride, :])
    x_col = jnp.concatenate(patches, axis=-1)            # (B, Hout, Wout, KH*KW*Cin)

    K = KH * KW * Cin
    M = B * Hout * Wout
    N = Cout

    TK = 128
    TN = 128
    TM = _pick_tm(M)
    Kp = _round_up(K, TK)
    Np = _round_up(N, TN)
    Mp = _round_up(M, TM)

    a = x_col.reshape(M, K)
    a = jnp.pad(a, ((0, Mp - M), (0, Kp - K)))           # (Mp, Kp) bf16, lane-dense K

    # (Cout, Cin, KH, KW) -> (KH, KW, Cin, Cout) -> (K, Cout), matching the patch order.
    w_col = jnp.transpose(weight, (2, 3, 1, 0)).reshape(K, N).astype(jnp.bfloat16)
    b = jnp.pad(w_col, ((0, Kp - K), (0, Np - N)))       # (Kp, Np) bf16, lane-dense N

    out = pl.pallas_call(
        _conv_matmul_kernel,
        out_shape=jax.ShapeDtypeStruct((Mp, Np), jnp.float32),
        grid_spec=pltpu.PrefetchScalarGridSpec(
            num_scalar_prefetch=0,
            grid=(Mp // TM, Np // TN, Kp // TK),
            in_specs=[
                pl.BlockSpec((TM, TK), lambda i, j, k: (i, k)),
                pl.BlockSpec((TK, TN), lambda i, j, k: (k, j)),
            ],
            out_specs=pl.BlockSpec((TM, TN), lambda i, j, k: (i, j)),
            scratch_shapes=[pltpu.VMEM((TM, TN), jnp.float32)],
        ),
        compiler_params=pltpu.CompilerParams(
            dimension_semantics=("parallel", "parallel", "arbitrary"),
            vmem_limit_bytes=64 * 1024 * 1024,
        ),
    )(a, b)

    # Strip channel / row padding, back to NCHW.
    y = out[:M, :N].reshape(B, Hout, Wout, N)
    return jnp.transpose(y, (0, 3, 1, 2)).astype(x_nchw.dtype)


def _reference(x_nchw, weight, *, stride=1):
    pad_h = (weight.shape[2] - 1) // 2
    pad_w = (weight.shape[3] - 1) // 2
    return jax.lax.conv_general_dilated(
        x_nchw.astype(jnp.float32), weight.astype(jnp.float32),
        window_strides=(stride, stride),
        padding=[(pad_h, pad_h), (pad_w, pad_w)],
        dimension_numbers=("NCHW", "OIHW", "NCHW"),
        precision=jax.lax.Precision.HIGHEST,
    )


if __name__ == "__main__":
    # Module config: C(nIn=4, nOut=8, kSize=3) on a (2, 4, 16, 16) input.
    B, nIn, nOut, k, H, W = 2, 4, 8, 3, 16, 16

    key = jax.random.PRNGKey(0)
    kx, kw = jax.random.split(key, 2)
    x = jax.random.normal(kx, (B, nIn, H, W), dtype=jnp.float32)
    fan_in = nIn * k * k
    weight = jax.random.normal(kw, (nOut, nIn, k, k), dtype=jnp.float32) / np.sqrt(fan_in)

    for stride in (1, 2):
        fwd = jax.jit(functools.partial(conv2d_forward, stride=stride))
        out = jax.block_until_ready(fwd(x, weight))

        # Tight check: same bf16-rounded operands, f32 accumulation (kernel precision model).
        x_bf = x.astype(jnp.bfloat16).astype(jnp.float32)
        w_bf = weight.astype(jnp.bfloat16).astype(jnp.float32)
        ref_bf = _reference(x_bf, w_bf, stride=stride)
        np.testing.assert_allclose(np.asarray(out), np.asarray(ref_bf), rtol=1e-3, atol=1e-3)

        # Loose check: full-f32 module semantics (bf16 operand rounding only).
        ref = _reference(x, weight, stride=stride)
        np.testing.assert_allclose(np.asarray(out), np.asarray(ref), rtol=5e-2, atol=5e-2)

    print("KERNEL_OK")
</pallas_src>

<mosaic_0001>
module attributes {stable_mosaic.version = 11 : i64} {
  func.func @_conv_matmul_kernel(%arg0: i32, %arg1: i32, %arg2: i32, %arg3: memref<256x128xbf16, #tpu.memory_space<vmem>>, %arg4: memref<128x128xbf16, #tpu.memory_space<vmem>>, %arg5: memref<256x128xf32, #tpu.memory_space<vmem>>, %arg6: memref<256x128xf32, #tpu.memory_space<vmem>>) attributes {dimension_semantics = [#tpu.dimension_semantics<parallel>, #tpu.dimension_semantics<parallel>, #tpu.dimension_semantics<arbitrary>], iteration_bounds = array<i64: 2, 1, 1>, scalar_prefetch = 0 : i64, scratch_operands = 1 : i64, tpu.core_type = #tpu.core_type<tc>, window_params = [{transform_indices = @transform_0, window_bounds = array<i64: 256, 128>}, {transform_indices = @transform_1, window_bounds = array<i64: 128, 128>}, {transform_indices = @transform_2, window_bounds = array<i64: 256, 128>}]} {
    %c0_i32 = arith.constant 0 : i32
    %0 = arith.cmpi eq, %arg2, %c0_i32 : i32
    %1 = arith.extui %0 : i1 to i32
    %c0_i32_0 = arith.constant 0 : i32
    %2 = arith.cmpi ne, %1, %c0_i32_0 : i32
    scf.if %2 {
      %cst_10 = arith.constant 0.000000e+00 : f32
      %12 = vector.broadcast %cst_10 : f32 to vector<256x128xf32>
      %c0_11 = arith.constant 0 : index
      %c0_12 = arith.constant 0 : index
      %13 = vector.load %arg6[%c0_11, %c0_12] : memref<256x128xf32, #tpu.memory_space<vmem>>, vector<256x128xf32>
      tpu.vector_store %arg6[%c0_11, %c0_12], %12 {strides = array<i32>} : memref<256x128xf32, #tpu.memory_space<vmem>>, vector<256x128xf32>,
    } else {
    }
    %c0 = arith.constant 0 : index
    %c0_1 = arith.constant 0 : index
    %3 = vector.load %arg6[%c0, %c0_1] : memref<256x128xf32, #tpu.memory_space<vmem>>, vector<256x128xf32>
    %c0_2 = arith.constant 0 : index
    %c0_3 = arith.constant 0 : index
    %4 = vector.load %arg3[%c0_2, %c0_3] : memref<256x128xbf16, #tpu.memory_space<vmem>>, vector<256x128xbf16>
    %c0_4 = arith.constant 0 : index
    %c0_5 = arith.constant 0 : index
    %5 = vector.load %arg4[%c0_4, %c0_5] : memref<128x128xbf16, #tpu.memory_space<vmem>>, vector<128x128xbf16>
    %cst = arith.constant dense<0.000000e+00> : vector<256x128xf32>
    %6 = tpu.matmul %4, %5, %cst {dimension_numbers = #tpu.dot_dimension_numbers<[1], [0], [0], [1], [0, 0, 1, 1], [], []>} : vector<256x128xbf16>, vector<128x128xbf16>, vector<256x128xf32> -> vector<256x128xf32>
    %7 = arith.addf %3, %6 : vector<256x128xf32>
    %c0_6 = arith.constant 0 : index
    %c0_7 = arith.constant 0 : index
    %8 = vector.load %arg6[%c0_6, %c0_7] : memref<256x128xf32, #tpu.memory_space<vmem>>, vector<256x128xf32>
    tpu.vector_store %arg6[%c0_6, %c0_7], %7 {strides = array<i32>} : memref<256x128xf32, #tpu.memory_space<vmem>>, vector<256x128xf32>,
    %c0_i32_8 = arith.constant 0 : i32
    %9 = arith.cmpi eq, %arg2, %c0_i32_8 : i32
    %10 = arith.extui %9 : i1 to i32
    %c0_i32_9 = arith.constant 0 : i32
    %11 = arith.cmpi ne, %10, %c0_i32_9 : i32
    scf.if %11 {
      %c0_10 = arith.constant 0 : index
      %c0_11 = arith.constant 0 : index
      %12 = vector.load %arg6[%c0_10, %c0_11] : memref<256x128xf32, #tpu.memory_space<vmem>>, vector<256x128xf32>
      %c0_12 = arith.constant 0 : index
      %c0_13 = arith.constant 0 : index
      %13 = vector.load %arg5[%c0_12, %c0_13] : memref<256x128xf32, #tpu.memory_space<vmem>>, vector<256x128xf32>
      tpu.vector_store %arg5[%c0_12, %c0_13], %12 {strides = array<i32>} : memref<256x128xf32, #tpu.memory_space<vmem>>, vector<256x128xf32>,
    } else {
    }
    return
  }
  func.func @transform_0(%arg0: i32, %arg1: i32, %arg2: i32) -> (i32, i32) {
    %c0_i32 = arith.constant 0 : i32
    return %arg0, %arg2 : i32, i32
  }
  func.func @transform_1(%arg0: i32, %arg1: i32, %arg2: i32) -> (i32, i32) {
    %c0_i32 = arith.constant 0 : i32
    return %arg2, %arg1 : i32, i32
  }
  func.func @transform_2(%arg0: i32, %arg1: i32, %arg2: i32) -> (i32, i32) {
    %c0_i32 = arith.constant 0 : i32
    return %arg0, %arg1 : i32, i32
  }
}

</mosaic_0001>

<bundles_post_ra>
// kernel: conv2d_forward.1
= control target key start
LH: loop header
LB: loop body
LE: loop exit
PB: predicated region body
PF: predicated region fallthrough
CT: control target
= control target key end

     0   :  { %s1016_s9 = smov 0   ;;  %s1018_s10 = smov 0   ;;  %s1132_s0 = inlined_call_operand.vmem [shape: bf16[512,128], index: 0, kind: input, shape index: {}]   ;;  %s1133_s1 = inlined_call_operand.vmem [shape: bf16[128,128], index: 1, kind: input, shape index: {}]   ;;  %s1134_s2 = inlined_call_operand.vmem [shape: f32[512,128], index: 2, kind: output, shape index: {}]  }
   0x1   :  { %s1020_s11 = smov 0  }
   0x2 LB: > { %s31_s12 = sadd.s32 1, %s995_s10  ;;  %p802_p0 = scmp.ge.s32.totalorder %s999_s11, 1  ;;  %s999_s11 = sphi %s1020_s11, %s12_s11   ;;  %s995_s10 = sphi %s1018_s10, %s1136_s10   ;;  %s991_s9 = sphi %s1016_s9, %s1135_s9  }
   0x3   : > { %p33_p1 = scmp.ge.s32.totalorder %s31_s12, 2  ;;  %p155_p2 = scmp.lt.s32.totalorder %s999_s11, 3 }
   0x5   : > { %s1138_s12 = smov (%p33_p1, %s31_s12), 0  ;;  %p156_p3 = pnand %p802_p0, %p155_p2 }
   0x6   : > { %s803_s21 = sshll.u32 (!%p156_p3), %s991_s9, 5 }
   0x7   : > { %159 = sbr.rel (%p156_p3) target bundleno = 235 (0xeb), region = 28  ;;  %p192_p4 = scmp.lt.s32.totalorder (!%p156_p3), %s803_s21, 63 }
   0xc   : > { %v928_v0 = vld [vmem:[%s1133_s1 + $0x38] sm:$0xff]  ;;  %v927_v1 = vld [vmem:[%s1133_s1 + $0x30] sm:$0xff]  ;;  %v926_v2 = vld [vmem:[%s1133_s1 + $0x28] sm:$0xff]  ;;  %s1140_s21 = smov (!%p192_p4, %s803_s21), 63 }
   0xd   : > { %478 = vmatpush.bf16.msra.mxu0 %v928_v0  ;;  %929 = vmatpush.bf16.msra.mxu1 %v928_v0  ;;  %v925_v3 = vld [vmem:[%s1133_s1 + $0x20] sm:$0xff]  ;;  %v924_v4 = vld [vmem:[%s1133_s1 + $0x18] sm:$0xff]  ;;  %v923_v5 = vld [vmem:[%s1133_s1 + $0x10] sm:$0xff]  ;;  %s804_s28 = sshll.u32 %s1140_s21, 2  ;;  %s806_s6 = sshll.u32 %s1140_s21, 3 }
   0xe   : > { %930 = vmatpush.bf16.msra.mxu2 %v928_v0  ;;  %931 = vmatpush.bf16.msra.mxu3 %v928_v0  ;;  %v922_v6 = vld [vmem:[%s1133_s1 + $0x8] sm:$0xff]  ;;  %v921_v7 = vld [vmem:[%s1133_s1] sm:$0xff]  ;;  %s1067_s5 = scalar_lea.vmem %s1132_s0, %s804_s28  ;;  %s1089_s9 = scalar_lea.vmem %s1134_s2, %s806_s6 }
   0xf   : > { %v905_v8 = vld [vmem:[%s1067_s5] sm:$0xff]  ;;  %v906_v12 = vld [vmem:[%s1067_s5 + $0x8] sm:$0xff]  ;;  %v907_v16 = vld [vmem:[%s1067_s5 + $0x10] sm:$0xff] }
  0x10   : > { %v909_v9 = vld [vmem:[%s1067_s5 + $0x20] sm:$0xff]  ;;  %v910_v13 = vld [vmem:[%s1067_s5 + $0x28] sm:$0xff]  ;;  %v911_v17 = vld [vmem:[%s1067_s5 + $0x30] sm:$0xff] }
  0x11   : > { %479 = vmatpush.bf16.msra.mxu0 %v927_v1  ;;  %932 = vmatpush.bf16.msra.mxu1 %v927_v1  ;;  %v913_v10 = vld [vmem:[%s1067_s5 + $0x40] sm:$0xff]  ;;  %v914_v14 = vld [vmem:[%s1067_s5 + $0x48] sm:$0xff]  ;;  %v915_v18 = vld [vmem:[%s1067_s5 + $0x50] sm:$0xff] }
  0x12   : > { %933 = vmatpush.bf16.msra.mxu2 %v927_v1  ;;  %934 = vmatpush.bf16.msra.mxu3 %v927_v1  ;;  %v917_v11 = vld [vmem:[%s1067_s5 + $0x60] sm:$0xff]  ;;  %v918_v15 = vld [vmem:[%s1067_s5 + $0x68] sm:$0xff]  ;;  %v919_v19 = vld [vmem:[%s1067_s5 + $0x70] sm:$0xff] }
  0x13   : > { %v908_v20 = vld [vmem:[%s1067_s5 + $0x18] sm:$0xff] }
  0x14   : > { %v912_v21 = vld [vmem:[%s1067_s5 + $0x38] sm:$0xff] }
  0x15   : > { %480 = vmatpush.bf16.msra.mxu0 %v926_v2  ;;  %935 = vmatpush.bf16.msra.mxu1 %v926_v2  ;;  %v916_v22 = vld [vmem:[%s1067_s5 + $0x58] sm:$0xff] }
  0x16   : > { %936 = vmatpush.bf16.msra.mxu2 %v926_v2  ;;  %937 = vmatpush.bf16.msra.mxu3 %v926_v2  ;;  %v920_v23 = vld [vmem:[%s1067_s5 + $0x78] sm:$0xff] }
  0x19   : > { %481 = vmatpush.bf16.msra.mxu0 %v925_v3  ;;  %938 = vmatpush.bf16.msra.mxu1 %v925_v3 }
  0x1a   : > { %939 = vmatpush.bf16.msra.mxu2 %v925_v3  ;;  %940 = vmatpush.bf16.msra.mxu3 %v925_v3 }
  0x1d   : > { %482 = vmatpush.bf16.msra.mxu0 %v924_v4  ;;  %941 = vmatpush.bf16.msra.mxu1 %v924_v4 }
  0x1e   : > { %942 = vmatpush.bf16.msra.mxu2 %v924_v4  ;;  %943 = vmatpush.bf16.msra.mxu3 %v924_v4 }
  0x21   : > { %483 = vmatpush.bf16.msra.mxu0 %v923_v5  ;;  %944 = vmatpush.bf16.msra.mxu1 %v923_v5 }
  0x22   : > { %945 = vmatpush.bf16.msra.mxu2 %v923_v5  ;;  %946 = vmatpush.bf16.msra.mxu3 %v923_v5 }
  0x25   : > { %484 = vmatpush.bf16.msra.mxu0 %v922_v6  ;;  %947 = vmatpush.bf16.msra.mxu1 %v922_v6 }
  0x26   : > { %948 = vmatpush.bf16.msra.mxu2 %v922_v6  ;;  %949 = vmatpush.bf16.msra.mxu3 %v922_v6 }
  0x29   : > { %485 = vmatpush.bf16.msra.mxu0 %v921_v7  ;;  %950 = vmatpush.bf16.msra.mxu1 %v921_v7 }
  0x2a   : > { %951 = vmatpush.bf16.msra.mxu2 %v921_v7  ;;  %952 = vmatpush.bf16.msra.mxu3 %v921_v7 }
  0x2c   : > { %486 = vmatmul.bf16.vlgmr.msra.gmra.mxu0 %v905_v8  ;;  %506 = vmatmul.bf16.vlgmr.msra.gmra.mxu1 %v909_v9 }
  0x2d   : > { %526 = vmatmul.bf16.vlgmr.msra.gmra.mxu2 %v913_v10  ;;  %546 = vmatmul.bf16.vlgmr.msra.gmra.mxu3 %v917_v11 }
  0x3c   : > { %491 = vmatmul.bf16.gmra.mxu0 %v906_v12  ;;  %511 = vmatmul.bf16.gmra.mxu1 %v910_v13 }
  0x3d   : > { %531 = vmatmul.bf16.gmra.mxu2 %v914_v14  ;;  %551 = vmatmul.bf16.gmra.mxu3 %v918_v15 }
  0x4c   : > { %496 = vmatmul.bf16.gmra.mxu0 %v907_v16  ;;  %516 = vmatmul.bf16.gmra.mxu1 %v911_v17 }
  0x4d   : > { %536 = vmatmul.bf16.gmra.mxu2 %v915_v18  ;;  %556 = vmatmul.bf16.gmra.mxu3 %v919_v19 }
  0x5c   : > { %501 = vmatmul.bf16.gmra.mxu0 %v908_v20  ;;  %521 = vmatmul.bf16.gmra.mxu1 %v912_v21 }
  0x5d   : > { %541 = vmatmul.bf16.gmra.mxu2 %v916_v22  ;;  %561 = vmatmul.bf16.gmra.mxu3 %v920_v23 }
  0xa9   : > { %v487_v24 = vpop.f32.mrf.mxu0  ;;  %v507_v25 = vpop.f32.mrf.mxu1 }
  0xaa   : > { %666 = vst [vmem:[%s1089_s9] sm:$0xff] %v487_v24 }
  0xab   : > { %674 = vst [vmem:[%s1089_s9 + $0x40] sm:$0xff] %v507_v25 }
  0xb0   : > { %v527_v26 = vpop.f32.mrf.mxu2  ;;  %v547_v27 = vpop.f32.mrf.mxu3 }
  0xb1   : > { %682 = vst [vmem:[%s1089_s9 + $0x80] sm:$0xff] %v527_v26  ;;  %v489_v28 = vpop.f32.mrf.mxu0  ;;  %v509_v29 = vpop.f32.mrf.mxu1 }
  0xb2   : > { %690 = vst [vmem:[%s1089_s9 + $0xc0] sm:$0xff] %v547_v27 }
  0xb3   : > { %667 = vst [vmem:[%s1089_s9 + $0x8] sm:$0xff] %v489_v28 }
  0xb4   : > { %675 = vst [vmem:[%s1089_s9 + $0x48] sm:$0xff] %v509_v29 }
  0xb8   : > { %v529_v30 = vpop.f32.mrf.mxu2  ;;  %v549_v31 = vpop.f32.mrf.mxu3 }
  0xb9   : > { %683 = vst [vmem:[%s1089_s9 + $0x88] sm:$0xff] %v529_v30  ;;  %v492_v32 = vpop.f32.mrf.mxu0  ;;  %v512_v33 = vpop.f32.mrf.mxu1 }
  0xba   : > { %691 = vst [vmem:[%s1089_s9 + $0xc8] sm:$0xff] %v549_v31 }
  0xbb   : > { %668 = vst [vmem:[%s1089_s9 + $0x10] sm:$0xff] %v492_v32 }
  0xbc   : > { %676 = vst [vmem:[%s1089_s9 + $0x50] sm:$0xff] %v512_v33 }
  0xc0   : > { %v532_v34 = vpop.f32.mrf.mxu2  ;;  %v552_v35 = vpop.f32.mrf.mxu3 }
  0xc1   : > { %684 = vst [vmem:[%s1089_s9 + $0x90] sm:$0xff] %v532_v34  ;;  %v494_v36 = vpop.f32.mrf.mxu0  ;;  %v514_v37 = vpop.f32.mrf.mxu1 }
  0xc2   : > { %692 = vst [vmem:[%s1089_s9 + $0xd0] sm:$0xff] %v552_v35 }
  0xc3   : > { %669 = vst [vmem:[%s1089_s9 + $0x18] sm:$0xff] %v494_v36 }
  0xc4   : > { %677 = vst [vmem:[%s1089_s9 + $0x58] sm:$0xff] %v514_v37 }
  0xc8   : > { %v534_v38 = vpop.f32.mrf.mxu2  ;;  %v554_v39 = vpop.f32.mrf.mxu3 }
  0xc9   : > { %685 = vst [vmem:[%s1089_s9 + $0x98] sm:$0xff] %v534_v38  ;;  %v497_v40 = vpop.f32.mrf.mxu0  ;;  %v517_v41 = vpop.f32.mrf.mxu1 }
  0xca   : > { %693 = vst [vmem:[%s1089_s9 + $0xd8] sm:$0xff] %v554_v39 }
  0xcb   : > { %670 = vst [vmem:[%s1089_s9 + $0x20] sm:$0xff] %v497_v40 }
  0xcc   : > { %678 = vst [vmem:[%s1089_s9 + $0x60] sm:$0xff] %v517_v41 }
  0xd0   : > { %v537_v42 = vpop.f32.mrf.mxu2  ;;  %v557_v43 = vpop.f32.mrf.mxu3 }
  0xd1   : > { %686 = vst [vmem:[%s1089_s9 + $0xa0] sm:$0xff] %v537_v42  ;;  %v499_v44 = vpop.f32.mrf.mxu0  ;;  %v519_v45 = vpop.f32.mrf.mxu1 }
  0xd2   : > { %694 = vst [vmem:[%s1089_s9 + $0xe0] sm:$0xff] %v557_v43 }
  0xd3   : > { %671 = vst [vmem:[%s1089_s9 + $0x28] sm:$0xff] %v499_v44 }
  0xd4   : > { %679 = vst [vmem:[%s1089_s9 + $0x68] sm:$0xff] %v519_v45 }
  0xd8   : > { %v539_v46 = vpop.f32.mrf.mxu2  ;;  %v559_v47 = vpop.f32.mrf.mxu3 }
  0xd9   : > { %687 = vst [vmem:[%s1089_s9 + $0xa8] sm:$0xff] %v539_v46  ;;  %v502_v48 = vpop.f32.mrf.mxu0  ;;  %v522_v49 = vpop.f32.mrf.mxu1 }
  0xda   : > { %695 = vst [vmem:[%s1089_s9 + $0xe8] sm:$0xff] %v559_v47 }
  0xdb   : > { %672 = vst [vmem:[%s1089_s9 + $0x30] sm:$0xff] %v502_v48 }
  0xdc   : > { %680 = vst [vmem:[%s1089_s9 + $0x70] sm:$0xff] %v522_v49 }
  0xe0   : > { %v542_v50 = vpop.f32.mrf.mxu2  ;;  %v562_v51 = vpop.f32.mrf.mxu3 }
  0xe1   : > { %688 = vst [vmem:[%s1089_s9 + $0xb0] sm:$0xff] %v542_v50  ;;  %v504_v52 = vpop.f32.mrf.mxu0  ;;  %v524_v53 = vpop.f32.mrf.mxu1 }
  0xe2   : > { %696 = vst [vmem:[%s1089_s9 + $0xf0] sm:$0xff] %v562_v51 }
  0xe3   : > { %673 = vst [vmem:[%s1089_s9 + $0x38] sm:$0xff] %v504_v52 }
  0xe4   : > { %681 = vst [vmem:[%s1089_s9 + $0x78] sm:$0xff] %v524_v53 }
  0xe8   : > { %v544_v54 = vpop.f32.mrf.mxu2  ;;  %v564_v55 = vpop.f32.mrf.mxu3 }
  0xe9   : > { %689 = vst [vmem:[%s1089_s9 + $0xb8] sm:$0xff] %v544_v54 }
  0xea   : > { %697 = vst [vmem:[%s1089_s9 + $0xf8] sm:$0xff] %v564_v55 }
  0xeb PF: > { %s12_s11 = sadd.s32 1, %s999_s11   ;;  %s1135_s9 = smov %s995_s10 }
  0xec   : > { %p9_p5 = scmp.ge.s32.totalorder %s12_s11, 4   ;;  %s1136_s10 = smov %s1138_s12 }
  0xee   :  { %11 = sbr.rel (!%p9_p5) target bundleno = 2 (0x2), region = 69 }

</bundles_post_ra>
